<compile_context>
chip_gen: v7x
topology: tpu7x:2x2x1
jax: 0.10.0
libtpu: 0.0.40
codegen_flags: <defaults>
</compile_context>

<pallas_src>
import functools

import jax
import jax.numpy as jnp
from jax.experimental import pallas as pl
from jax.experimental.pallas import tpu as pltpu


def _sdpa_kernel(q_ref, k_ref, v_ref, mask_ref,
                 out_ref, attn_ref, log_attn_ref,
                 *, inv_temperature):
    # Blocks: q (TB, TQ, D), k (TB, Lk, D), v (TB, Lk, Dv), mask (TB, 1, Lk).
    # Fold 1/temperature into q (TQ*D multiplies instead of TQ*Lk) so the
    # per-score epilogue below is a single add.
    q = q_ref[...] * jnp.asarray(inv_temperature, dtype=q_ref.dtype)
    k = k_ref[...]
    v = v_ref[...]
    m = mask_ref[...]

    # scores = (q/T) @ k^T on the MXU, contracting the last dim of BOTH
    # operands (batched dot_general; no explicit k.T / XLU relayout), f32 acc.
    scores = jnp.einsum("bqd,bkd->bqk", q, k,
                        preferred_element_type=jnp.float32)       # (TB, TQ, Lk)

    # masked_fill(mask == 0, -1e9)/T as an additive bias computed on the single
    # (TB, 1, Lk) mask row (pre-scaled by 1/T), broadcast over the query axis.
    # Masked logits become (score - 1e9)/T: identical to the previous additive
    # scheme, sub-ulp vs. an exact fill, and it vanishes after softmax.
    bias = jnp.where(m == 0.0,
                     jnp.float32(-1e9 * inv_temperature),
                     jnp.float32(0.0))                            # (TB, 1, Lk)
    scores = scores + bias

    # numerically-stable softmax / log_softmax along the key axis
    row_max = jnp.max(scores, axis=-1, keepdims=True)
    shifted = scores - row_max
    exps = jnp.exp(shifted)
    denom = jnp.sum(exps, axis=-1, keepdims=True)                 # (TB, TQ, 1)
    # Exact reciprocal on the small (TB, TQ, 1) column, then a broadcast
    # multiply: removes the full (TQ, Lk)-tile divide from the VALU path.
    inv_denom = pl.reciprocal(denom, approx=False)
    attn = exps * inv_denom
    log_attn = shifted - jnp.log(denom)

    # output = attn @ v on the MXU.  If v is low-precision (bf16), feed the
    # probabilities in v.dtype so the matmul runs at the bf16 MXU rate; the
    # f32 attn output below is unaffected.
    p = attn if v.dtype == jnp.float32 else attn.astype(v.dtype)
    out = jnp.einsum("bqk,bkd->bqd", p, v,
                     preferred_element_type=jnp.float32)          # (TB, TQ, Dv)

    out_ref[...] = out.astype(out_ref.dtype)
    attn_ref[...] = attn.astype(attn_ref.dtype)
    log_attn_ref[...] = log_attn.astype(log_attn_ref.dtype)


def _vmem_budget_bytes():
    """Generation-aware (buffer budget, scoped vmem limit) in bytes."""
    cap = 64 * 1024 * 1024
    try:
        cap = int(getattr(pltpu.get_tpu_info(), "vmem_capacity_bytes", cap))
    except Exception:
        pass  # conservative (v7x-sized) default
    if cap <= 64 * 1024 * 1024:
        # v7x: 64 MiB physical / 32 MiB default scoped -> modest pipelined
        # buffers and a limit with real headroom below physical.
        return 22 * 1024 * 1024, 40 * 1024 * 1024
    # v5e / v6e: 128 MiB physical -> bigger resident tiles (fewer grid steps,
    # fuller writeback DMAs); this is the only lever on the HBM-write-bound
    # regime these chips sit in.
    return 64 * 1024 * 1024, 96 * 1024 * 1024


def _choose_tiles(B, Lq, Lk, D, Dv, budget_bytes):
    """Pick (TB, TQ) so one pipelined grid step fits the per-chip budget."""

    def step_bytes(tb, tq):
        # q tile and the three output tiles are double-buffered by the
        # pipeline; K/V/mask block indices never change along the inner query
        # axis, so their DMA only fires on batch-block changes — count once.
        dbuf = tb * (tq * D + tq * Dv + 2 * tq * Lk)       # q + out + attn + log_attn
        resident = tb * (Lk * D + Lk * Dv + Lk)            # k, v, mask
        # live in-kernel f32 temporaries (scores/exps + attn + log_attn ~3x,
        # plus the small out tile) are NOT double-buffered but do occupy VMEM.
        live = tb * (3 * tq * Lk + tq * Dv)
        return 4 * (2 * dbuf + resident + live)             # f32 words -> bytes

    # Query tile: full Lq when small, else a multiple of 8 capped at 512
    # (keeps the lane/sublane-legal (8,128) block constraint satisfied).
    tq = Lq if Lq <= 512 else 512
    while step_bytes(1, tq) > budget_bytes and tq > 8:
        tq = max(8, (tq // 2) & ~7)

    # Fold batches into one grid step while they divide B and fit the budget:
    # amortizes the ~0.35 us/step grid overhead when per-batch work is tiny.
    tb = 1
    while tb < B and B % (tb * 2) == 0 and step_bytes(tb * 2, tq) <= budget_bytes:
        tb *= 2
    return tb, tq


def scaled_dot_product_attention(q, k, v, mask, temperature):
    """Pallas wrapper. q:(B,Lq,D) k:(B,Lk,D) v:(B,Lk,Dv) mask:(B,Lk)."""
    B, Lq, D = q.shape
    _, Lk, Dv = v.shape
    assert k.shape == (B, Lk, D)
    assert mask.shape == (B, Lk)

    budget_bytes, vmem_limit = _vmem_budget_bytes()
    tb, tq = _choose_tiles(B, Lq, Lk, D, Dv, budget_bytes)
    nb = B // tb
    nq = pl.cdiv(Lq, tq)

    # reshape mask so each block's trailing two dims equal the full array dims;
    # note: the == 0 test is exact for 0/1 masks (same contract as the module).
    mask3 = mask.reshape(B, 1, Lk).astype(jnp.float32)

    kernel = functools.partial(_sdpa_kernel,
                               inv_temperature=1.0 / float(temperature))

    out_shapes = (
        jax.ShapeDtypeStruct((B, Lq, Dv), q.dtype),      # output
        jax.ShapeDtypeStruct((B, Lq, Lk), jnp.float32),  # attn
        jax.ShapeDtypeStruct((B, Lq, Lk), jnp.float32),  # log_attn
    )

    grid_spec = pltpu.PrefetchScalarGridSpec(
        num_scalar_prefetch=0,
        grid=(nb, nq),
        in_specs=[
            pl.BlockSpec((tb, tq, D), lambda b, i: (b, i, 0)),   # q
            pl.BlockSpec((tb, Lk, D), lambda b, i: (b, 0, 0)),   # k (full Lk)
            pl.BlockSpec((tb, Lk, Dv), lambda b, i: (b, 0, 0)),  # v (full Lk)
            pl.BlockSpec((tb, 1, Lk), lambda b, i: (b, 0, 0)),   # mask row
        ],
        out_specs=[
            pl.BlockSpec((tb, tq, Dv), lambda b, i: (b, i, 0)),
            pl.BlockSpec((tb, tq, Lk), lambda b, i: (b, i, 0)),
            pl.BlockSpec((tb, tq, Lk), lambda b, i: (b, i, 0)),
        ],
    )

    # When nb >= 2, bias cross-TC sharding to the batch axis so each TC keeps
    # its own full-Lk K/V block resident (avoids duplicated K/V HBM reads on
    # v7x's two TensorCores); with nb == 1 keep both axes parallel.
    if nb >= 2:
        dims = ("parallel", "arbitrary")
    else:
        dims = ("parallel", "parallel")

    # Advisory cost: two matmuls + softmax epilogue; roofline is dominated by
    # the 2 * B * Lq * Lk * 4 bytes of attn/log_attn written back to HBM.
    flops = 2 * B * Lq * Lk * (D + Dv) + 6 * B * Lq * Lk
    bytes_accessed = 4 * (B * Lq * D + B * Lk * D + B * Lk * Dv + B * Lk
                          + B * Lq * Dv + 2 * B * Lq * Lk)
    cost = pl.CostEstimate(flops=flops,
                           transcendentals=B * Lq * Lk + B * Lq,
                           bytes_accessed=bytes_accessed)

    return pl.pallas_call(
        kernel,
        out_shape=out_shapes,
        grid_spec=grid_spec,
        compiler_params=pltpu.CompilerParams(
            dimension_semantics=dims,
            vmem_limit_bytes=vmem_limit),
        cost_estimate=cost,
    )(q, k, v, mask3)


def _reference(q, k, v, mask, temperature):
    attn = jnp.einsum("bqd,bkd->bqk", q, k)
    m = jnp.broadcast_to(mask[:, None, :], attn.shape)
    attn = jnp.where(m == 0, -1e9, attn)
    attn = attn / temperature
    log_attn = jax.nn.log_softmax(attn, axis=2)
    attn_sm = jax.nn.softmax(attn, axis=2)
    out = jnp.einsum("bqk,bkd->bqd", attn_sm, v)
    return out, attn_sm, log_attn


if __name__ == "__main__":
    key = jax.random.PRNGKey(0)
    B, Lq, Lk, D, Dv = 2, 8, 8, 32, 32
    temperature = float(D) ** 0.5

    kq, kk, kv, km = jax.random.split(key, 4)
    q = jax.random.normal(kq, (B, Lq, D), dtype=jnp.float32)
    k = jax.random.normal(kk, (B, Lk, D), dtype=jnp.float32)
    v = jax.random.normal(kv, (B, Lk, Dv), dtype=jnp.float32)
    # binary mask over keys: 1 = keep, 0 = masked out
    mask = (jax.random.uniform(km, (B, Lk)) > 0.25).astype(jnp.float32)
    # make sure at least one key is unmasked per row
    mask = mask.at[:, 0].set(1.0)

    out, attn, log_attn = scaled_dot_product_attention(q, k, v, mask, temperature)
    jax.block_until_ready((out, attn, log_attn))

    ref_out, ref_attn, ref_log_attn = _reference(q, k, v, mask, temperature)
    assert jnp.allclose(out, ref_out, atol=1e-4, rtol=1e-4)
    assert jnp.allclose(attn, ref_attn, atol=1e-5, rtol=1e-4)
    # masked entries are O(-1e8); rtol covers the sub-ulp additive-bias diff
    assert jnp.allclose(log_attn, ref_log_attn, atol=1e-4, rtol=1e-4)

    print("KERNEL_OK")
</pallas_src>

<mosaic_0001>
module attributes {stable_mosaic.version = 11 : i64} {
  func.func @_sdpa_kernel(%arg0: i32, %arg1: i32, %arg2: memref<2x8x32xf32, #tpu.memory_space<vmem>>, %arg3: memref<2x8x32xf32, #tpu.memory_space<vmem>>, %arg4: memref<2x8x32xf32, #tpu.memory_space<vmem>>, %arg5: memref<2x1x8xf32, #tpu.memory_space<vmem>>, %arg6: memref<2x8x32xf32, #tpu.memory_space<vmem>>, %arg7: memref<2x8x8xf32, #tpu.memory_space<vmem>>, %arg8: memref<2x8x8xf32, #tpu.memory_space<vmem>>) attributes {dimension_semantics = [#tpu.dimension_semantics<parallel>, #tpu.dimension_semantics<parallel>], iteration_bounds = array<i64: 1, 1>, scalar_prefetch = 0 : i64, scratch_operands = 0 : i64, tpu.core_type = #tpu.core_type<tc>, window_params = [{transform_indices = @transform_0, window_bounds = array<i64: 2, 8, 32>}, {transform_indices = @transform_1, window_bounds = array<i64: 2, 8, 32>}, {transform_indices = @transform_2, window_bounds = array<i64: 2, 8, 32>}, {transform_indices = @transform_3, window_bounds = array<i64: 2, 1, 8>}, {transform_indices = @transform_4, window_bounds = array<i64: 2, 8, 32>}, {transform_indices = @transform_5, window_bounds = array<i64: 2, 8, 8>}, {transform_indices = @transform_6, window_bounds = array<i64: 2, 8, 8>}]} {
    %c0 = arith.constant 0 : index
    %c0_0 = arith.constant 0 : index
    %c0_1 = arith.constant 0 : index
    %0 = vector.load %arg2[%c0, %c0_0, %c0_1] : memref<2x8x32xf32, #tpu.memory_space<vmem>>, vector<2x8x32xf32>
    %cst = arith.constant 0.176776692 : f32
    %1 = vector.broadcast %cst : f32 to vector<2x8x32xf32>
    %2 = arith.mulf %0, %1 : vector<2x8x32xf32>
    %c0_2 = arith.constant 0 : index
    %c0_3 = arith.constant 0 : index
    %c0_4 = arith.constant 0 : index
    %3 = vector.load %arg3[%c0_2, %c0_3, %c0_4] : memref<2x8x32xf32, #tpu.memory_space<vmem>>, vector<2x8x32xf32>
    %c0_5 = arith.constant 0 : index
    %c0_6 = arith.constant 0 : index
    %c0_7 = arith.constant 0 : index
    %4 = vector.load %arg4[%c0_5, %c0_6, %c0_7] : memref<2x8x32xf32, #tpu.memory_space<vmem>>, vector<2x8x32xf32>
    %c0_8 = arith.constant 0 : index
    %c0_9 = arith.constant 0 : index
    %c0_10 = arith.constant 0 : index
    %5 = vector.load %arg5[%c0_8, %c0_9, %c0_10] : memref<2x1x8xf32, #tpu.memory_space<vmem>>, vector<2x1x8xf32>
    "tpu.trace_start"() <{level = 10 : i32, message = "bqd,bkd->bqk"}> : () -> ()
    %cst_11 = arith.constant dense<0.000000e+00> : vector<2x8x8xf32>
    %6 = tpu.matmul %2, %3, %cst_11 {dimension_numbers = #tpu.dot_dimension_numbers<[2], [2], [1], [1], [0, 0, 0, 1, 1, 1], [0], [0]>} : vector<2x8x32xf32>, vector<2x8x32xf32>, vector<2x8x8xf32> -> vector<2x8x8xf32>
    %cst_12 = arith.constant 0.000000e+00 : f32
    "tpu.trace_stop"() : () -> ()
    %7 = vector.broadcast %cst_12 : f32 to vector<2x1x8xf32>
    %8 = arith.cmpf oeq, %5, %7 : vector<2x1x8xf32>
    %cst_13 = arith.constant 0xCD28965F : f32
    %cst_14 = arith.constant 0.000000e+00 : f32
    %9 = vector.broadcast %cst_13 : f32 to vector<2x1x8xf32>
    %10 = vector.broadcast %cst_14 : f32 to vector<2x1x8xf32>
    %11 = arith.select %8, %9, %10 : vector<2x1x8xi1>, vector<2x1x8xf32>
    %12 = vector.broadcast %11 : vector<2x1x8xf32> to vector<2x8x8xf32>
    %13 = arith.addf %6, %12 : vector<2x8x8xf32>
    %cst_15 = arith.constant dense<0xFF800000> : vector<2x8xf32>
    %14 = vector.multi_reduction <maximumf>, %13, %cst_15 [2] : vector<2x8x8xf32> to vector<2x8xf32>
    %15 = vector.shape_cast %14 : vector<2x8xf32> to vector<2x8x1xf32>
    %16 = vector.broadcast %15 : vector<2x8x1xf32> to vector<2x8x8xf32>
    %17 = arith.subf %13, %16 : vector<2x8x8xf32>
    %18 = math.exp %17 : vector<2x8x8xf32>
    %cst_16 = arith.constant dense<0.000000e+00> : vector<2x8xf32>
    %19 = vector.multi_reduction <add>, %18, %cst_16 [2] : vector<2x8x8xf32> to vector<2x8xf32>
    %20 = vector.shape_cast %19 : vector<2x8xf32> to vector<2x8x1xf32>
    %21 = tpu.reciprocal %20 : vector<2x8x1xf32> -> vector<2x8x1xf32>
    %22 = vector.broadcast %21 : vector<2x8x1xf32> to vector<2x8x8xf32>
    %23 = arith.mulf %18, %22 : vector<2x8x8xf32>
    %24 = math.log %20 : vector<2x8x1xf32>
    %25 = vector.broadcast %24 : vector<2x8x1xf32> to vector<2x8x8xf32>
    %26 = arith.subf %17, %25 : vector<2x8x8xf32>
    "tpu.trace_start"() <{level = 10 : i32, message = "bqk,bkd->bqd"}> : () -> ()
    %cst_17 = arith.constant dense<0.000000e+00> : vector<2x8x32xf32>
    %27 = tpu.matmul %23, %4, %cst_17 {dimension_numbers = #tpu.dot_dimension_numbers<[2], [1], [1], [2], [0, 0, 0, 1, 1, 2], [0], [0]>} : vector<2x8x8xf32>, vector<2x8x32xf32>, vector<2x8x32xf32> -> vector<2x8x32xf32>
    "tpu.trace_stop"() : () -> ()
    %c0_18 = arith.constant 0 : index
    %c0_19 = arith.constant 0 : index
    %c0_20 = arith.constant 0 : index
    %28 = vector.load %arg6[%c0_18, %c0_19, %c0_20] : memref<2x8x32xf32, #tpu.memory_space<vmem>>, vector<2x8x32xf32>
    tpu.vector_store %arg6[%c0_18, %c0_19, %c0_20], %27 {strides = array<i32>} : memref<2x8x32xf32, #tpu.memory_space<vmem>>, vector<2x8x32xf32>,
    %c0_21 = arith.constant 0 : index
    %c0_22 = arith.constant 0 : index
    %c0_23 = arith.constant 0 : index
    %29 = vector.load %arg7[%c0_21, %c0_22, %c0_23] : memref<2x8x8xf32, #tpu.memory_space<vmem>>, vector<2x8x8xf32>
    tpu.vector_store %arg7[%c0_21, %c0_22, %c0_23], %23 {strides = array<i32>} : memref<2x8x8xf32, #tpu.memory_space<vmem>>, vector<2x8x8xf32>,
    %c0_24 = arith.constant 0 : index
    %c0_25 = arith.constant 0 : index
    %c0_26 = arith.constant 0 : index
    %30 = vector.load %arg8[%c0_24, %c0_25, %c0_26] : memref<2x8x8xf32, #tpu.memory_space<vmem>>, vector<2x8x8xf32>
    tpu.vector_store %arg8[%c0_24, %c0_25, %c0_26], %26 {strides = array<i32>} : memref<2x8x8xf32, #tpu.memory_space<vmem>>, vector<2x8x8xf32>,
    return
  }
  func.func @transform_0(%arg0: i32, %arg1: i32) -> (i32, i32, i32) {
    %c0_i32 = arith.constant 0 : i32
    %c0_i32_0 = arith.constant 0 : i32
    return %arg0, %arg1, %c0_i32 : i32, i32, i32
  }
  func.func @transform_1(%arg0: i32, %arg1: i32) -> (i32, i32, i32) {
    %c0_i32 = arith.constant 0 : i32
    %c0_i32_0 = arith.constant 0 : i32
    %c0_i32_1 = arith.constant 0 : i32
    return %arg0, %c0_i32, %c0_i32_0 : i32, i32, i32
  }
  func.func @transform_2(%arg0: i32, %arg1: i32) -> (i32, i32, i32) {
    %c0_i32 = arith.constant 0 : i32
    %c0_i32_0 = arith.constant 0 : i32
    %c0_i32_1 = arith.constant 0 : i32
    return %arg0, %c0_i32, %c0_i32_0 : i32, i32, i32
  }
  func.func @transform_3(%arg0: i32, %arg1: i32) -> (i32, i32, i32) {
    %c0_i32 = arith.constant 0 : i32
    %c0_i32_0 = arith.constant 0 : i32
    %c0_i32_1 = arith.constant 0 : i32
    return %arg0, %c0_i32, %c0_i32_0 : i32, i32, i32
  }
  func.func @transform_4(%arg0: i32, %arg1: i32) -> (i32, i32, i32) {
    %c0_i32 = arith.constant 0 : i32
    %c0_i32_0 = arith.constant 0 : i32
    return %arg0, %arg1, %c0_i32 : i32, i32, i32
  }
  func.func @transform_5(%arg0: i32, %arg1: i32) -> (i32, i32, i32) {
    %c0_i32 = arith.constant 0 : i32
    %c0_i32_0 = arith.constant 0 : i32
    return %arg0, %arg1, %c0_i32 : i32, i32, i32
  }
  func.func @transform_6(%arg0: i32, %arg1: i32) -> (i32, i32, i32) {
    %c0_i32 = arith.constant 0 : i32
    %c0_i32_0 = arith.constant 0 : i32
    return %arg0, %arg1, %c0_i32 : i32, i32, i32
  }
}

</mosaic_0001>

<bundles_post_ra>
// kernel: tpu_custom_call.1
= control target key start
LH: loop header
LB: loop body
LE: loop exit
PB: predicated region body
PF: predicated region fallthrough
CT: control target
= control target key end

     0   :  { %12 = vsyncpa [#allocation3], 0  ;;  %s836_s0 = inlined_call_operand.hbm [shape: f32[2,8,32], index: 0, kind: input, shape index: {}]   ;;  %s837_s1 = inlined_call_operand.hbm [shape: f32[2,8,32], index: 1, kind: input, shape index: {}]   ;;  %s838_s2 = inlined_call_operand.hbm [shape: f32[2,8,32], index: 2, kind: input, shape index: {}]   ;;  %s839_s3 = inlined_call_operand.vmem [shape: f32[2,1,8], index: 3, kind: input, shape index: {}]   ;;  %s840_s4 = inlined_call_operand.hbm [shape: f32[2,8,32], index: 4, kind: output, shape index: {0}]   ;;  %s841_s5 = inlined_call_operand.hbm [shape: f32[2,8,8], index: 5, kind: output, shape index: {1}]   ;;  %s842_s6 = inlined_call_operand.hbm [shape: f32[2,8,8], index: 6, kind: output, shape index: {2}]  }
   0x1   :  { %13 = vsyncpa [#allocation6], 0 }
   0x2   :  { %14 = vsyncpa [#allocation4], 0 }
   0x3   :  { %15 = vsyncpa [#allocation10], 0  ;;  %s668_s21 = smov [#allocation5]   ;;  %s669_s23 = smov [#allocation2]  }
   0x4   :  { %s33_s22 = sshll.u32 %s668_s21, 4  ;;  %s21_s24 = sshll.u32 %s669_s23, 4  ;;  %s34_s22 = int_to_ptr.vmem [resolvable:$true] %s33_s22  ;;  %s713_s24 = int_to_ptr.vmem [resolvable:$true] %s21_s24 }
   0x5   :  { %s528_s27 = scalar_lea.hbm %s837_s1, 256 }
   0x6   :  { %p529_p0 = scmp.ne.s32.totalorder %s837_s1, %s528_s27  ;;  %p532_p1 = scmp.lt.u32.totalorder %s528_s27, %s837_s1 }
   0x8   :  { %p534_p2 = pnand %p532_p1, %p529_p0 }
   0xa   :  { %537 = shalt.err (!%p534_p2)
}
   0xb   :  { %s538_s8 = scalar_lea.vmem %s34_s22, 256  ;;  %p543_p4 = scmp.lt.s32.totalorder %s34_s22, %s34_s22 }
   0xc   :  { %p539_p3 = scmp.ne.s32.totalorder %s34_s22, %s538_s8  ;;  %p544_p5 = scmp.lt.s32.totalorder %s538_s8, %s538_s8 }
   0xe   :  { %p545_p6 = por %p544_p5, %p543_p4 }
  0x10   :  { %p546_p7 = pnand %p545_p6, %p539_p3 }
  0x12   :  { %549 = shalt.err (!%p546_p7)
}
  0x13   :  { %s670_s9 = smov 128   ;;  %s671_s10 = smov 8  }
  0x14   :  { %39 = dma.hbm_to_vmem [thread:$0]  %s837_s1, 256, %s34_s22, [#allocation6], %s670_s9, %s670_s9, %s671_s10  }
  0x15   :  { %s550_s15 = scalar_lea.hbm %s836_s0, 256 }
  0x16   :  { %p551_p8 = scmp.ne.s32.totalorder %s836_s0, %s550_s15  ;;  %p554_p9 = scmp.lt.u32.totalorder %s550_s15, %s836_s0 }
  0x18   :  { %p556_p10 = pnand %p554_p9, %p551_p8 }
  0x1a   :  { %559 = shalt.err (!%p556_p10)
}
  0x1b   :  { %s560_s20 = scalar_lea.vmem %s713_s24, 256  ;;  %p565_p12 = scmp.lt.s32.totalorder %s713_s24, %s713_s24 }
  0x1c   :  { %p561_p11 = scmp.ne.s32.totalorder %s713_s24, %s560_s20  ;;  %p566_p13 = scmp.lt.s32.totalorder %s560_s20, %s560_s20 }
  0x1e   :  { %p567_p0 = por %p566_p13, %p565_p12 }
  0x20   :  { %p568_p1 = pnand %p567_p0, %p561_p11 }
  0x22   :  { %571 = shalt.err (!%p568_p1)
}
  0x23   :  { %27 = dma.hbm_to_vmem [thread:$0]  %s836_s0, 256, %s713_s24, [#allocation3], %s670_s9, %s670_s9, %s671_s10  }
  0x24   :  { %s672_s22 = smov [#allocation7]   ;;  %s572_s27 = scalar_lea.hbm %s838_s2, 256 }
  0x25   :  { %s45_s23 = sshll.u32 %s672_s22, 4  ;;  %p573_p2 = scmp.ne.s32.totalorder %s838_s2, %s572_s27  ;;  %s46_s23 = int_to_ptr.vmem [resolvable:$true] %s45_s23 }
  0x26   :  { %p576_p3 = scmp.lt.u32.totalorder %s572_s27, %s838_s2 }
  0x28   :  { %p578_p4 = pnand %p576_p3, %p573_p2 }
  0x2a   :  { %581 = shalt.err (!%p578_p4)
}
  0x2b   :  { %s582_s8 = scalar_lea.vmem %s46_s23, 256  ;;  %p587_p6 = scmp.lt.s32.totalorder %s46_s23, %s46_s23 }
  0x2c   :  { %p583_p5 = scmp.ne.s32.totalorder %s46_s23, %s582_s8  ;;  %p588_p7 = scmp.lt.s32.totalorder %s582_s8, %s582_s8 }
  0x2e   :  { %p589_p8 = por %p588_p7, %p587_p6 }
  0x30   :  { %p590_p9 = pnand %p589_p8, %p583_p5 }
  0x32   :  { %593 = shalt.err (!%p590_p9)
}
  0x33   :  { %51 = dma.hbm_to_vmem [thread:$0]  %s838_s2, 256, %s46_s23, [#allocation6], %s670_s9, %s670_s9, %s671_s10  }
  0x34   :  { %660 = dma.done.wait [#allocation3], 256  }
  0x35   :  { %661 = vsyncadd [#allocation3], 4294967040 }
  0x36   :  { %662 = dma.done.wait [#allocation6], 512  }
  0x37   :  { %663 = vsyncadd [#allocation6], 4294966784  ;;  %v673_v0 = vmov 0.0   ;;  %vm674_vm0 = vmmov 0   ;;  %vm89_vm1 = vcmask 261120   ;;  %v67_v1 = vld [vmem:[#allocation5] sm:$0xff]  ;;  %v79_v7 = vlaneseq }
  0x38   :  { %486 = vmatprep.subr.mxu0 %v673_v0  ;;  %488 = vmatprep.mubr.msk.f32.mxu0 %vm674_vm0, %v673_v0  ;;  %v63_v2 = vld [vmem:[#allocation2] sm:$0xff]  ;;  %v68_v3 = vld [vmem:[#allocation5 + $0x8] sm:$0xff]  ;;  %v64_v5 = vld [vmem:[#allocation2 + $0x8] sm:$0xff]  ;;  %vm242_vm4 = vcmask 64512  }
  0x39   :  { %491 = vmatprep.subr.mxu1 %v673_v0  ;;  %493 = vmatprep.mubr.msk.f32.mxu1 %vm674_vm0, %v673_v0  ;;  %v65_v4 = vmul.f32 0.17677669, %v63_v2  ;;  %v66_v6 = vmul.f32 0.17677669, %v64_v5  ;;  %v71_v8 = vld [vmem:[%s839_s3] sm:$0x1] }
  0x3a   :  { %487 = vmatpush3.xpose.msk.msra.mxu0 %vm89_vm1, %v67_v1  ;;  %492 = vmatpush3.xpose.msk.msra.mxu1 %vm89_vm1, %v68_v3  ;;  %v72_v9 = vld [vmem:[%s839_s3 + $0x1] sm:$0x1]  ;;  %v80_v10 = vshrl.u32 %v79_v7, 7  ;;  %vm73_vm2 = vcmp.eq.f32.partialorder %v71_v8, 0.0  ;;  %v70_v35 = vld [vmem:[#allocation7 + $0x8] sm:$0xff]  ;;  %s675_s3 = smov [#allocation9]  }
  0x3b   :  { %496 = vmatprep.subr.mxu0 %v673_v0  ;;  %501 = vmatprep.subr.mxu1 %v673_v0  ;;  %vm74_vm3 = vcmp.eq.f32.partialorder %v72_v9, 0.0  ;;  %v75_v12 = vsel %vm73_vm2, -1.7677669e+08, %v673_v0  ;;  %v69_v34 = vld [vmem:[#allocation7] sm:$0xff]  ;;  %s440_s14 = sshll.u32 %s675_s3, 4  ;;  %s441_s14 = int_to_ptr.vmem [resolvable:$true] %s440_s14 }
  0x3c   :  { %v81_v11 = vsub.s32 0, %v80_v10  ;;  %v76_v13 = vsel %vm74_vm3, -1.7677669e+08, %v673_v0  ;;  %s594_s15 = scalar_lea.vmem %s441_s14, 256  ;;  %p599_p11 = scmp.lt.s32.totalorder %s441_s14, %s441_s14 }
  0x3d   :  { %489 = vmatmul.mubr.msk.f32.vlgmr.msra.gmra.mrb[0].mxu0 %vm89_vm1, %v65_v4  ;;  %494 = vmatmul.mubr.msk.f32.vlgmr.msra.gmra.mrb[0].mxu1 %vm89_vm1, %v66_v6  ;;  %p595_p10 = scmp.ne.s32.totalorder %s441_s14, %s594_s15  ;;  %p600_p12 = scmp.lt.s32.totalorder %s594_s15, %s594_s15 }
  0x3e   :  { %498 = vmatprep.mubr.msk.f32.mxu0 %vm674_vm0, %v673_v0  ;;  %503 = vmatprep.mubr.msk.f32.mxu1 %vm674_vm0, %v673_v0  ;;  %v82_v14 = vrot.slane %v75_v12, %v81_v11  ;;  %v86_v15 = vrot.slane %v76_v13, %v81_v11 }
  0x3f   :  { %497 = vmatpush3.msra.mxu0 %v69_v34  ;;  %502 = vmatpush3.msra.mxu1 %v70_v35  ;;  %p601_p13 = por %p600_p12, %p599_p11 }
  0x41   :  { %p602_p0 = pnand %p601_p13, %p595_p10 }
 0x110   :  { %v162_v16 = vpop.f32.mrb[0].mxu0  ;;  %v238_v17 = vpop.f32.mrb[0].mxu1 }
 0x111   :  { %v163_v18 = vadd.f32 %v162_v16, %v82_v14  ;;  %v490_v19 = vpop.f32.mrb[1].mxu0  ;;  %v239_v20 = vadd.f32 %v238_v17, %v86_v15  ;;  %v495_v21 = vpop.f32.mrb[1].mxu1 }
 0x113   :  { %v243_v22 = vsel %vm242_vm4, %v163_v18, -inf  ;;  %v246_v23 = vsel %vm242_vm4, %v239_v20, -inf }
 0x114   :  { %244 = vmax.xlane.f32.xlu0 %v243_v22 }
 0x118   :  { %247 = vmax.xlane.f32.xlu0 %v246_v23 }
 0x1a1   :  { %v245_v24 = vpop.xlane.xlu0 %244 }
 0x1a2   :  { %v249_v25 = vsub.f32 %v163_v18, %v245_v24 }
 0x1a4   :  { %v251_v26 = vmul.f32 1.442695, %v249_v25 }
 0x1a5   :  { %v248_v27 = vpop.xlane.xlu0 %247 }
 0x1a6   :  { %516 = vpow2.f32 %v251_v26  ;;  %v250_v28 = vsub.f32 %v239_v20, %v248_v27 }
 0x1a8   :  { %v253_v29 = vmul.f32 1.442695, %v250_v28 }
 0x1aa   :  { %518 = vpow2.f32 %v253_v29 }
 0x1b0   :  { %v517_v30 = vpop.eup %516 }
 0x1b1   :  { %v255_v31 = vsel %vm242_vm4, %v517_v30, 0.0 }
 0x1b2   :  { %256 = vadd.xlane.f32.xlu1 %v255_v31 }
 0x1b4   :  { %v519_v32 = vpop.eup %518 }
 0x1b5   :  { %v258_v33 = vsel %vm242_vm4, %v519_v32, 0.0 }
 0x1b6   :  { %259 = vadd.xlane.f32.xlu1 %v258_v33 }
 0x23f   :  { %v257_v36 = vpop.xlane.xlu1 %256 }
 0x240   :  { %520 = vrcp.f32 %v257_v36 }
 0x241   :  { %522 = vlog2.f32 %v257_v36 }
 0x243   :  { %v260_v37 = vpop.xlane.xlu1 %259 }
 0x244   :  { %524 = vrcp.f32 %v260_v37 }
 0x245   :  { %526 = vlog2.f32 %v260_v37 }
 0x24a   :  { %v521_v38 = vpop.eup %520 }
 0x24b   :  { %v523_v39 = vpop.eup %522  ;;  %v263_v40 = vmul.f32 %v521_v38, %v517_v30 }
 0x24c   :  { %v266_v41 = vmul.f32 0.6931472, %v523_v39 }
 0x24d   :  { %499 = vmatmul.mubr.msk.f32.vlgmr.msra.gmra.mrb[2].mxu0 %vm242_vm4, %v263_v40  ;;  %419 = vst.msk [vmem:[#allocation9] sm:$0xff] %vm242_vm4, %v263_v40 }
 0x24e   :  { %v525_v42 = vpop.eup %524  ;;  %v269_v43 = vsub.f32 %v249_v25, %v266_v41 }
 0x24f   :  { %v527_v44 = vpop.eup %526  ;;  %v264_v45 = vmul.f32 %v525_v42, %v519_v32 }
 0x250   :  { %421 = vst.msk [vmem:[#allocation11] sm:$0xff] %vm242_vm4, %v269_v43  ;;  %v268_v46 = vmul.f32 0.6931472, %v527_v44 }
 0x251   :  { %420 = vst.msk [vmem:[#allocation9 + $0x8] sm:$0xff] %vm242_vm4, %v264_v45  ;;  %504 = vmatmul.mubr.msk.f32.vlgmr.msra.gmra.mrb[2].mxu1 %vm242_vm4, %v264_v45 }
 0x252   :  { %v270_v47 = vsub.f32 %v250_v28, %v268_v46 }
 0x254   :  { %422 = vst.msk [vmem:[#allocation11 + $0x8] sm:$0xff] %vm242_vm4, %v270_v47 }
 0x255   :  { %605 = shalt.err (!%p602_p0)
}
 0x256   :  { %s606_s18 = scalar_lea.hbm %s841_s5, 256 }
 0x257   :  { %p607_p1 = scmp.ne.s32.totalorder %s841_s5, %s606_s18  ;;  %p610_p2 = scmp.lt.u32.totalorder %s606_s18, %s841_s5 }
 0x259   :  { %p612_p3 = pnand %p610_p2, %p607_p1 }
 0x25b   :  { %615 = shalt.err (!%p612_p3)
}
 0x25c   :  { %446 = dma.vmem_to_hbm [thread:$0]  %s441_s14, 256, %s841_s5, [#allocation10], %s670_s9, %s670_s9, %s671_s10  }
 0x25d   :  { %s676_s25 = smov [#allocation11]  }
 0x25e   :  { %s452_s26 = sshll.u32 %s676_s25, 4  ;;  %s453_s26 = int_to_ptr.vmem [resolvable:$true] %s452_s26 }
 0x25f   :  { %s616_s27 = scalar_lea.vmem %s453_s26, 256  ;;  %p621_p5 = scmp.lt.s32.totalorder %s453_s26, %s453_s26 }
 0x260   :  { %p617_p4 = scmp.ne.s32.totalorder %s453_s26, %s616_s27  ;;  %p622_p6 = scmp.lt.s32.totalorder %s616_s27, %s616_s27 }
 0x262   :  { %p623_p7 = por %p622_p6, %p621_p5 }
 0x264   :  { %p624_p8 = pnand %p623_p7, %p617_p4 }
 0x266   :  { %627 = shalt.err (!%p624_p8)
}
 0x267   :  { %s628_s30 = scalar_lea.hbm %s842_s6, 256 }
 0x268   :  { %p629_p9 = scmp.ne.s32.totalorder %s842_s6, %s628_s30  ;;  %p632_p10 = scmp.lt.u32.totalorder %s628_s30, %s842_s6 }
 0x26a   :  { %p634_p11 = pnand %p632_p10, %p629_p9 }
 0x26c   :  { %637 = shalt.err (!%p634_p11)
}
 0x26d   :  { %458 = dma.vmem_to_hbm [thread:$0]  %s453_s26, 256, %s842_s6, [#allocation10], %s670_s9, %s670_s9, %s671_s10  }
 0x26e   :  { %s677_s11 = smov [#allocation8]  }
 0x26f   :  { %s428_s12 = sshll.u32 %s677_s11, 4  ;;  %s429_s12 = int_to_ptr.vmem [resolvable:$true] %s428_s12 }
 0x270   :  { %s638_s13 = scalar_lea.vmem %s429_s12, 256  ;;  %p643_p13 = scmp.lt.s32.totalorder %s429_s12, %s429_s12 }
 0x271   :  { %p639_p12 = scmp.ne.s32.totalorder %s429_s12, %s638_s13  ;;  %p644_p0 = scmp.lt.s32.totalorder %s638_s13, %s638_s13 }
 0x273   :  { %p645_p1 = por %p644_p0, %p643_p13 }
 0x275   :  { %p646_p2 = pnand %p645_p1, %p639_p12 }
 0x320   :  { %v340_v48 = vpop.f32.mrb[2].mxu0 }
 0x321   :  { %417 = vst.msk [vmem:[#allocation8] sm:$0xff] %vm89_vm1, %v340_v48  ;;  %v500_v49 = vpop.f32.mrb[3].mxu0 }
 0x324   :  { %v413_v50 = vpop.f32.mrb[2].mxu1 }
 0x325   :  { %418 = vst.msk [vmem:[#allocation8 + $0x8] sm:$0xff] %vm89_vm1, %v413_v50  ;;  %v505_v51 = vpop.f32.mrb[3].mxu1 }
 0x326   :  { %649 = shalt.err (!%p646_p2)
}
 0x327   :  { %s650_s14 = scalar_lea.hbm %s840_s4, 256 }
 0x328   :  { %p651_p3 = scmp.ne.s32.totalorder %s840_s4, %s650_s14  ;;  %p654_p4 = scmp.lt.u32.totalorder %s650_s14, %s840_s4 }
 0x32a   :  { %p656_p5 = pnand %p654_p4, %p651_p3 }
 0x32c   :  { %659 = shalt.err (!%p656_p5)
}
 0x32d   :  { %434 = dma.vmem_to_hbm [thread:$0]  %s429_s12, 256, %s840_s4, [#allocation4], %s670_s9, %s670_s9, %s671_s10  }
 0x32e   :  { %664 = dma.done.wait [#allocation4], 256  }
 0x32f   :  { %665 = vsyncadd [#allocation4], 4294967040 }
 0x330   :  { %666 = dma.done.wait [#allocation10], 512  }
 0x331   :  { %667 = vsyncadd [#allocation10], 4294966784 }
 0x332   :  { %468 = vsyncpa [#allocation3], 1 }
 0x333   :  { %469 = vsyncpa [#allocation6], 1 }
 0x334   :  { %470 = vsyncpa [#allocation4], 1 }
 0x335   :  { %471 = vsyncpa [#allocation10], 1 }

</bundles_post_ra>
